<compile_context>
chip_gen: v5e
topology: v5e:2x2
jax: 0.10.0
libtpu: 0.0.40
codegen_flags: <defaults>
</compile_context>

<pallas_src>
import jax
import jax.numpy as jnp
from jax.experimental import pallas as pl
from jax.experimental.pallas import tpu as pltpu


def _normal_reg_kernel(n_ref, v_ref, w_ref, loss_ref, cnt_ref, acc_loss, acc_cnt):
    t = pl.program_id(2)

    @pl.when(t == 0)
    def _init():
        acc_loss[...] = jnp.zeros_like(acc_loss)
        acc_cnt[...] = jnp.zeros_like(acc_cnt)

    # Component-planar loads; cast to f32 in-kernel (inputs may travel as bf16).
    n0 = n_ref[0].astype(jnp.float32)            # (S_pad, TN)
    n1 = n_ref[1].astype(jnp.float32)
    n2 = n_ref[2].astype(jnp.float32)
    v0 = v_ref[0].astype(jnp.float32)            # (1, TN), broadcast over samples
    v1 = v_ref[1].astype(jnp.float32)
    v2 = v_ref[2].astype(jnp.float32)
    w = w_ref[...].astype(jnp.float32)           # (S_pad, TN)

    ndv = n0 * v0 + n1 * v1 + n2 * v2            # three VPU FMAs, no axis=-1 reduce
    neg = jnp.minimum(ndv, 0.0)                  # single VPU min (== where(ndv<0, ndv, 0))

    acc_loss[...] += w * neg * neg               # pure elementwise accumulation
    acc_cnt[...] += (ndv < 0.0).astype(jnp.float32)

    @pl.when(t == pl.num_programs(2) - 1)
    def _finalize():
        # single cross-lane/sublane reduce per (pass, chunk), lane-dense store
        loss_ref[...] = jnp.broadcast_to(jnp.sum(acc_loss[...]), loss_ref.shape)
        cnt_ref[...] = jnp.broadcast_to(jnp.sum(acc_cnt[...]), cnt_ref.shape)


def _keep_dma_dtype(x):
    # keep bf16 across the DMA (cast inside the kernel); everything else -> f32
    return x if x.dtype == jnp.bfloat16 else x.astype(jnp.float32)


def _run_normal_reg(passes, tile_n=None):
    """passes: list of {'normal': (N,S,3), 'weights': (N,S), 'view_dir': (N,3)}.

    Returns (loss_per_pass, neg_count_per_pass), each float32 of shape (P,).
    """
    P = len(passes)
    S_max = max(p["normal"].shape[1] for p in passes)
    N_max = max(p["normal"].shape[0] for p in passes)
    S_pad = ((S_max + 7) // 8) * 8

    if tile_n is None:
        # grow the lane-tile (fewer grid steps, less per-step overhead) but keep
        # (2 pipeline buffers of inputs + f32 accumulators) well inside the
        # scoped-VMEM default on every chip (v7x has only 64 MiB total VMEM).
        def vmem_bytes(tn):
            step_in = (3 * S_pad * tn + S_pad * tn + 3 * tn) * 4   # conservative f32
            return 2 * step_in + 2 * S_pad * tn * 4

        TN = 128 * max(1, min(8, pl.cdiv(N_max, 128)))
        while TN > 128 and vmem_bytes(TN) > (16 << 20):
            TN -= 128
    else:
        TN = tile_n
    assert TN % 128 == 0

    n_tiles = pl.cdiv(N_max, TN)
    C = 2 if n_tiles >= 2 else 1        # ray-chunks: extra parallel axis (megacore)
    Tpc = pl.cdiv(n_tiles, C)           # ray-tiles per chunk (reduction axis)
    N_pad = C * Tpc * TN

    normals, viewdirs, weights = [], [], []
    for p in passes:
        n = _keep_dma_dtype(p["normal"])     # (N, S, 3)
        w = _keep_dma_dtype(p["weights"])    # (N, S)
        v = _keep_dma_dtype(p["view_dir"])   # (N, 3)
        N, S, _ = n.shape
        n_t = jnp.pad(jnp.transpose(n, (2, 1, 0)),
                      ((0, 0), (0, S_pad - S), (0, N_pad - N)))
        w_t = jnp.pad(jnp.transpose(w, (1, 0)),
                      ((0, S_pad - S), (0, N_pad - N)))
        v_t = jnp.pad(jnp.transpose(v, (1, 0))[:, None, :],
                      ((0, 0), (0, 0), (0, N_pad - N)))
        normals.append(n_t)
        weights.append(w_t)
        viewdirs.append(v_t)

    normal_a = jnp.stack(normals)       # (P, 3, S_pad, N_pad)
    viewdir_a = jnp.stack(viewdirs)     # (P, 3, 1,    N_pad)
    weight_a = jnp.stack(weights)       # (P, S_pad,   N_pad)

    loss_out, cnt_out = pl.pallas_call(
        _normal_reg_kernel,
        out_shape=(
            jax.ShapeDtypeStruct((P, C, 8, 128), jnp.float32),
            jax.ShapeDtypeStruct((P, C, 8, 128), jnp.float32),
        ),
        grid_spec=pltpu.PrefetchScalarGridSpec(
            num_scalar_prefetch=0,
            grid=(P, C, Tpc),
            in_specs=[
                pl.BlockSpec((None, 3, S_pad, TN),
                             lambda p, c, t: (p, 0, 0, c * Tpc + t)),
                pl.BlockSpec((None, 3, 1, TN),
                             lambda p, c, t: (p, 0, 0, c * Tpc + t)),
                pl.BlockSpec((None, S_pad, TN),
                             lambda p, c, t: (p, 0, c * Tpc + t)),
            ],
            out_specs=(
                pl.BlockSpec((None, None, 8, 128), lambda p, c, t: (p, c, 0, 0)),
                pl.BlockSpec((None, None, 8, 128), lambda p, c, t: (p, c, 0, 0)),
            ),
            scratch_shapes=[
                pltpu.VMEM((S_pad, TN), jnp.float32),   # penalty accumulator
                pltpu.VMEM((S_pad, TN), jnp.float32),   # negative-count accumulator
            ],
        ),
        compiler_params=pltpu.CompilerParams(
            dimension_semantics=("parallel", "parallel", "arbitrary")),
    )(normal_a, viewdir_a, weight_a)

    loss_per_pass = jnp.sum(loss_out[:, :, 0, 0], axis=1)   # (P,)
    cnt_per_pass = jnp.sum(cnt_out[:, :, 0, 0], axis=1)     # (P,)
    return loss_per_pass, cnt_per_pass


class NormalRegLoss:
    """JAX/Pallas port of the PyTorch NormalRegLoss module (forward only)."""

    def __init__(self, lambda_nr_reg=0.1, keyword="normal_an"):
        self.lambda_nr_reg = lambda_nr_reg
        self.keyword = keyword

    def __call__(self, inputs):
        typs = ["coarse"]
        if "rgb_fine" in inputs:
            typs.append("fine")

        passes, totals = [], []
        for typ in typs:
            normal_flat = jnp.reshape(inputs[f"{self.keyword}_{typ}"], (-1, 3))
            weights_flat = jnp.reshape(inputs[f"weights_{typ}"], (-1,))
            view_dir = jnp.squeeze(inputs[f"rays_d_{typ}"])          # (N, 3)
            N = view_dir.shape[0]
            M = normal_flat.shape[0]
            assert M % N == 0, "samples must be an exact multiple of rays"
            S = M // N                                               # repeat_num
            passes.append({
                "normal": jnp.reshape(normal_flat, (N, S, 3)),
                "weights": jnp.reshape(weights_flat, (N, S)),
                "view_dir": view_dir,
            })
            totals.append(M)

        # single fused pallas_call for coarse (+ fine)
        loss_pp, cnt_pp = _run_normal_reg(passes)

        loss_dict = {}
        for i, typ in enumerate(typs):
            loss_dict[f"{typ}_nr_reg_{self.keyword[-2:]}"] = loss_pp[i]
        # TODO(synk): torch used .item() (host sync) for the bad-normal count;
        # here it stays a traced scalar.
        perc_ng_nr = cnt_pp[len(typs) - 1] * 100.0 / totals[-1]

        for k in loss_dict.keys():
            loss_dict[k] = self.lambda_nr_reg * jnp.mean(loss_dict[k])
        loss = sum(l for l in loss_dict.values())
        return loss, loss_dict, perc_ng_nr


# ----------------------------- pure-JAX references -----------------------------

def _pass_reference(normal, weights, view_dir):
    ndv = jnp.sum(normal * view_dir[:, None, :], axis=-1)            # (N, S)
    loss = jnp.sum(weights * jnp.minimum(0.0, ndv) ** 2)
    cnt = jnp.sum((ndv < 0).astype(jnp.float32))
    return loss, cnt


def _reference(inputs, lambda_nr_reg=0.1, keyword="normal_an"):
    def one(typ):
        normal = jnp.reshape(inputs[f"{keyword}_{typ}"], (-1, 3))
        weights = jnp.reshape(inputs[f"weights_{typ}"], (-1,))
        view_dir = jnp.squeeze(inputs[f"rays_d_{typ}"])
        rep = normal.shape[0] // view_dir.shape[0]
        vd = jnp.repeat(view_dir, rep, axis=0)
        ndv = jnp.sum(normal * vd, axis=-1)
        loss = jnp.sum(weights * jnp.minimum(0.0, ndv) ** 2)
        perc = jnp.sum((ndv < 0).astype(jnp.float32)) * 100.0 / ndv.size
        return loss, perc

    loss_dict = {}
    lc, pc = one("coarse")
    loss_dict[f"coarse_nr_reg_{keyword[-2:]}"] = lambda_nr_reg * lc
    perc = pc
    if "rgb_fine" in inputs:
        lf, pf = one("fine")
        loss_dict[f"fine_nr_reg_{keyword[-2:]}"] = lambda_nr_reg * lf
        perc = pf
    return sum(loss_dict.values()), loss_dict, perc


if __name__ == "__main__":
    key = jax.random.PRNGKey(0)
    N, S = 8, 16  # 8 rays, 16 samples per ray -> 128 flattened samples
    ks = jax.random.split(key, 8)
    inputs = {
        "normal_an_coarse": jax.random.normal(ks[0], (N, S, 3), jnp.float32),
        "weights_coarse": jax.random.uniform(ks[1], (N, S), jnp.float32),
        "rays_d_coarse": jax.random.normal(ks[2], (N, 3), jnp.float32),
        "normal_an_fine": jax.random.normal(ks[3], (N, S, 3), jnp.float32),
        "weights_fine": jax.random.uniform(ks[4], (N, S), jnp.float32),
        "rays_d_fine": jax.random.normal(ks[5], (N, 3), jnp.float32),
        "rgb_fine": jax.random.uniform(ks[6], (N, 3), jnp.float32),
    }

    model = NormalRegLoss(lambda_nr_reg=0.1, keyword="normal_an")
    loss, loss_dict, perc_ng_nr = model(inputs)
    loss = jax.block_until_ready(loss)
    perc_ng_nr = jax.block_until_ready(perc_ng_nr)

    ref_loss, ref_dict, ref_perc = _reference(inputs)
    assert jnp.allclose(loss, ref_loss, rtol=1e-5, atol=1e-5), (loss, ref_loss)
    assert jnp.allclose(perc_ng_nr, ref_perc, rtol=1e-5, atol=1e-5), (perc_ng_nr, ref_perc)
    for k in ref_dict:
        assert jnp.allclose(loss_dict[k], ref_dict[k], rtol=1e-5, atol=1e-5), (k,)

    # Second check: uneven shapes, multi-tile grid, chunked parallel axis (C=2),
    # sublane + lane padding, and different shapes per pass.
    kk = jax.random.split(jax.random.PRNGKey(1), 6)
    pass_c = {"normal": jax.random.normal(kk[0], (300, 13, 3), jnp.float32),
              "weights": jax.random.uniform(kk[1], (300, 13), jnp.float32),
              "view_dir": jax.random.normal(kk[2], (300, 3), jnp.float32)}
    pass_f = {"normal": jax.random.normal(kk[3], (260, 10, 3), jnp.float32),
              "weights": jax.random.uniform(kk[4], (260, 10), jnp.float32),
              "view_dir": jax.random.normal(kk[5], (260, 3), jnp.float32)}
    loss_pp, cnt_pp = _run_normal_reg([pass_c, pass_f], tile_n=128)
    loss_pp = jax.block_until_ready(loss_pp)
    for i, p in enumerate([pass_c, pass_f]):
        rl, rc = _pass_reference(p["normal"], p["weights"], p["view_dir"])
        assert jnp.allclose(loss_pp[i], rl, rtol=1e-4, atol=1e-4), (i, loss_pp[i], rl)
        assert jnp.allclose(cnt_pp[i], rc), (i, cnt_pp[i], rc)

    print("KERNEL_OK")
</pallas_src>

<mosaic_0001>
module attributes {stable_mosaic.version = 11 : i64} {
  func.func @_normal_reg_kernel(%arg0: i32, %arg1: i32, %arg2: i32, %arg3: memref<1x3x16x128xf32, #tpu.memory_space<vmem>>, %arg4: memref<1x3x1x128xf32, #tpu.memory_space<vmem>>, %arg5: memref<1x16x128xf32, #tpu.memory_space<vmem>>, %arg6: memref<1x1x8x128xf32, #tpu.memory_space<vmem>>, %arg7: memref<1x1x8x128xf32, #tpu.memory_space<vmem>>, %arg8: memref<16x128xf32, #tpu.memory_space<vmem>>, %arg9: memref<16x128xf32, #tpu.memory_space<vmem>>) attributes {dimension_semantics = [#tpu.dimension_semantics<parallel>, #tpu.dimension_semantics<parallel>, #tpu.dimension_semantics<arbitrary>], iteration_bounds = array<i64: 2, 1, 1>, scalar_prefetch = 0 : i64, scratch_operands = 2 : i64, tpu.core_type = #tpu.core_type<tc>, window_params = [{transform_indices = @transform_0, window_bounds = array<i64: 1, 3, 16, 128>}, {transform_indices = @transform_1, window_bounds = array<i64: 1, 3, 1, 128>}, {transform_indices = @transform_2, window_bounds = array<i64: 1, 16, 128>}, {transform_indices = @transform_3, window_bounds = array<i64: 1, 1, 8, 128>}, {transform_indices = @transform_4, window_bounds = array<i64: 1, 1, 8, 128>}]} {
    %c0_i32 = arith.constant 0 : i32
    %0 = arith.cmpi eq, %arg2, %c0_i32 : i32
    %1 = arith.extui %0 : i1 to i32
    %c0_i32_0 = arith.constant 0 : i32
    %2 = arith.cmpi ne, %1, %c0_i32_0 : i32
    scf.if %2 {
      %cst_36 = arith.constant 0.000000e+00 : f32
      %42 = vector.broadcast %cst_36 : f32 to vector<16x128xf32>
      %c0_37 = arith.constant 0 : index
      %c0_38 = arith.constant 0 : index
      %43 = vector.load %arg8[%c0_37, %c0_38] : memref<16x128xf32, #tpu.memory_space<vmem>>, vector<16x128xf32>
      tpu.vector_store %arg8[%c0_37, %c0_38], %42 {strides = array<i32>} : memref<16x128xf32, #tpu.memory_space<vmem>>, vector<16x128xf32>,
      %cst_39 = arith.constant 0.000000e+00 : f32
      %44 = vector.broadcast %cst_39 : f32 to vector<16x128xf32>
      %c0_40 = arith.constant 0 : index
      %c0_41 = arith.constant 0 : index
      %45 = vector.load %arg9[%c0_40, %c0_41] : memref<16x128xf32, #tpu.memory_space<vmem>>, vector<16x128xf32>
      tpu.vector_store %arg9[%c0_40, %c0_41], %44 {strides = array<i32>} : memref<16x128xf32, #tpu.memory_space<vmem>>, vector<16x128xf32>,
    } else {
    }
    %c0 = arith.constant 0 : index
    %c0_1 = arith.constant 0 : index
    %c0_2 = arith.constant 0 : index
    %c0_3 = arith.constant 0 : index
    %3 = vector.load %arg3[%c0, %c0_1, %c0_2, %c0_3] : memref<1x3x16x128xf32, #tpu.memory_space<vmem>>, vector<1x1x16x128xf32>
    %4 = vector.shape_cast %3 : vector<1x1x16x128xf32> to vector<16x128xf32>
    %c0_4 = arith.constant 0 : index
    %c1 = arith.constant 1 : index
    %c0_5 = arith.constant 0 : index
    %c0_6 = arith.constant 0 : index
    %5 = vector.load %arg3[%c0_4, %c1, %c0_5, %c0_6] : memref<1x3x16x128xf32, #tpu.memory_space<vmem>>, vector<1x1x16x128xf32>
    %6 = vector.shape_cast %5 : vector<1x1x16x128xf32> to vector<16x128xf32>
    %c0_7 = arith.constant 0 : index
    %c2 = arith.constant 2 : index
    %c0_8 = arith.constant 0 : index
    %c0_9 = arith.constant 0 : index
    %7 = vector.load %arg3[%c0_7, %c2, %c0_8, %c0_9] : memref<1x3x16x128xf32, #tpu.memory_space<vmem>>, vector<1x1x16x128xf32>
    %8 = vector.shape_cast %7 : vector<1x1x16x128xf32> to vector<16x128xf32>
    %c0_10 = arith.constant 0 : index
    %c0_11 = arith.constant 0 : index
    %c0_12 = arith.constant 0 : index
    %c0_13 = arith.constant 0 : index
    %9 = vector.load %arg4[%c0_10, %c0_11, %c0_12, %c0_13] : memref<1x3x1x128xf32, #tpu.memory_space<vmem>>, vector<1x1x1x128xf32>
    %10 = vector.shape_cast %9 : vector<1x1x1x128xf32> to vector<1x128xf32>
    %c0_14 = arith.constant 0 : index
    %c1_15 = arith.constant 1 : index
    %c0_16 = arith.constant 0 : index
    %c0_17 = arith.constant 0 : index
    %11 = vector.load %arg4[%c0_14, %c1_15, %c0_16, %c0_17] : memref<1x3x1x128xf32, #tpu.memory_space<vmem>>, vector<1x1x1x128xf32>
    %12 = vector.shape_cast %11 : vector<1x1x1x128xf32> to vector<1x128xf32>
    %c0_18 = arith.constant 0 : index
    %c2_19 = arith.constant 2 : index
    %c0_20 = arith.constant 0 : index
    %c0_21 = arith.constant 0 : index
    %13 = vector.load %arg4[%c0_18, %c2_19, %c0_20, %c0_21] : memref<1x3x1x128xf32, #tpu.memory_space<vmem>>, vector<1x1x1x128xf32>
    %14 = vector.shape_cast %13 : vector<1x1x1x128xf32> to vector<1x128xf32>
    %c0_22 = arith.constant 0 : index
    %c0_23 = arith.constant 0 : index
    %c0_24 = arith.constant 0 : index
    %15 = vector.load %arg5[%c0_22, %c0_23, %c0_24] : memref<1x16x128xf32, #tpu.memory_space<vmem>>, vector<1x16x128xf32>
    %16 = vector.shape_cast %15 : vector<1x16x128xf32> to vector<16x128xf32>
    %17 = vector.broadcast %10 : vector<1x128xf32> to vector<16x128xf32>
    %18 = arith.mulf %4, %17 : vector<16x128xf32>
    %19 = vector.broadcast %12 : vector<1x128xf32> to vector<16x128xf32>
    %20 = arith.mulf %6, %19 : vector<16x128xf32>
    %21 = arith.addf %18, %20 : vector<16x128xf32>
    %22 = vector.broadcast %14 : vector<1x128xf32> to vector<16x128xf32>
    %23 = arith.mulf %8, %22 : vector<16x128xf32>
    %24 = arith.addf %21, %23 : vector<16x128xf32>
    %cst = arith.constant 0.000000e+00 : f32
    %25 = vector.broadcast %cst : f32 to vector<16x128xf32>
    %26 = arith.minimumf %24, %25 : vector<16x128xf32>
    %c0_25 = arith.constant 0 : index
    %c0_26 = arith.constant 0 : index
    %27 = vector.load %arg8[%c0_25, %c0_26] : memref<16x128xf32, #tpu.memory_space<vmem>>, vector<16x128xf32>
    %28 = arith.mulf %16, %26 : vector<16x128xf32>
    %29 = arith.mulf %28, %26 : vector<16x128xf32>
    %30 = arith.addf %27, %29 : vector<16x128xf32>
    %c0_27 = arith.constant 0 : index
    %c0_28 = arith.constant 0 : index
    %31 = vector.load %arg8[%c0_27, %c0_28] : memref<16x128xf32, #tpu.memory_space<vmem>>, vector<16x128xf32>
    tpu.vector_store %arg8[%c0_27, %c0_28], %30 {strides = array<i32>} : memref<16x128xf32, #tpu.memory_space<vmem>>, vector<16x128xf32>,
    %c0_29 = arith.constant 0 : index
    %c0_30 = arith.constant 0 : index
    %32 = vector.load %arg9[%c0_29, %c0_30] : memref<16x128xf32, #tpu.memory_space<vmem>>, vector<16x128xf32>
    %cst_31 = arith.constant 0.000000e+00 : f32
    %33 = vector.broadcast %cst_31 : f32 to vector<16x128xf32>
    %34 = arith.cmpf olt, %24, %33 : vector<16x128xf32>
    %35 = arith.extui %34 : vector<16x128xi1> to vector<16x128xi32>
    %36 = arith.sitofp %35 : vector<16x128xi32> to vector<16x128xf32>
    %37 = arith.addf %32, %36 : vector<16x128xf32>
    %c0_32 = arith.constant 0 : index
    %c0_33 = arith.constant 0 : index
    %38 = vector.load %arg9[%c0_32, %c0_33] : memref<16x128xf32, #tpu.memory_space<vmem>>, vector<16x128xf32>
    tpu.vector_store %arg9[%c0_32, %c0_33], %37 {strides = array<i32>} : memref<16x128xf32, #tpu.memory_space<vmem>>, vector<16x128xf32>,
    %c0_i32_34 = arith.constant 0 : i32
    %39 = arith.cmpi eq, %arg2, %c0_i32_34 : i32
    %40 = arith.extui %39 : i1 to i32
    %c0_i32_35 = arith.constant 0 : i32
    %41 = arith.cmpi ne, %40, %c0_i32_35 : i32
    scf.if %41 {
      %c0_36 = arith.constant 0 : index
      %c0_37 = arith.constant 0 : index
      %42 = vector.load %arg8[%c0_36, %c0_37] : memref<16x128xf32, #tpu.memory_space<vmem>>, vector<16x128xf32>
      %43 = vector.shape_cast %42 : vector<16x128xf32> to vector<1x16x128xf32>
      %cst_38 = arith.constant dense<0.000000e+00> : vector<1xf32>
      %44 = vector.multi_reduction <add>, %43, %cst_38 [1, 2] : vector<1x16x128xf32> to vector<1xf32>
      %45 = vector.shape_cast %44 : vector<1xf32> to vector<1x1x1xf32>
      %46 = vector.extract %45[0, 0, 0] : f32 from vector<1x1x1xf32>
      %47 = vector.broadcast %46 : f32 to vector<8x128xf32>
      %c0_39 = arith.constant 0 : index
      %c0_40 = arith.constant 0 : index
      %c0_41 = arith.constant 0 : index
      %c0_42 = arith.constant 0 : index
      %48 = vector.load %arg6[%c0_39, %c0_40, %c0_41, %c0_42] : memref<1x1x8x128xf32, #tpu.memory_space<vmem>>, vector<1x1x8x128xf32>
      %49 = vector.shape_cast %48 : vector<1x1x8x128xf32> to vector<8x128xf32>
      %50 = vector.shape_cast %47 : vector<8x128xf32> to vector<1x1x8x128xf32>
      tpu.vector_store %arg6[%c0_39, %c0_40, %c0_41, %c0_42], %50 {strides = array<i32>} : memref<1x1x8x128xf32, #tpu.memory_space<vmem>>, vector<1x1x8x128xf32>,
      %c0_43 = arith.constant 0 : index
      %c0_44 = arith.constant 0 : index
      %51 = vector.load %arg9[%c0_43, %c0_44] : memref<16x128xf32, #tpu.memory_space<vmem>>, vector<16x128xf32>
      %52 = vector.shape_cast %51 : vector<16x128xf32> to vector<1x16x128xf32>
      %cst_45 = arith.constant dense<0.000000e+00> : vector<1xf32>
      %53 = vector.multi_reduction <add>, %52, %cst_45 [1, 2] : vector<1x16x128xf32> to vector<1xf32>
      %54 = vector.shape_cast %53 : vector<1xf32> to vector<1x1x1xf32>
      %55 = vector.extract %54[0, 0, 0] : f32 from vector<1x1x1xf32>
      %56 = vector.broadcast %55 : f32 to vector<8x128xf32>
      %c0_46 = arith.constant 0 : index
      %c0_47 = arith.constant 0 : index
      %c0_48 = arith.constant 0 : index
      %c0_49 = arith.constant 0 : index
      %57 = vector.load %arg7[%c0_46, %c0_47, %c0_48, %c0_49] : memref<1x1x8x128xf32, #tpu.memory_space<vmem>>, vector<1x1x8x128xf32>
      %58 = vector.shape_cast %57 : vector<1x1x8x128xf32> to vector<8x128xf32>
      %59 = vector.shape_cast %56 : vector<8x128xf32> to vector<1x1x8x128xf32>
      tpu.vector_store %arg7[%c0_46, %c0_47, %c0_48, %c0_49], %59 {strides = array<i32>} : memref<1x1x8x128xf32, #tpu.memory_space<vmem>>, vector<1x1x8x128xf32>,
    } else {
    }
    return
  }
  func.func @transform_0(%arg0: i32, %arg1: i32, %arg2: i32) -> (i32, i32, i32, i32) {
    %c1_i32 = arith.constant 1 : i32
    %0 = arith.muli %arg1, %c1_i32 : i32
    %1 = arith.addi %0, %arg2 : i32
    %c0_i32 = arith.constant 0 : i32
    %c0_i32_0 = arith.constant 0 : i32
    %c0_i32_1 = arith.constant 0 : i32
    return %arg0, %c0_i32, %c0_i32_0, %1 : i32, i32, i32, i32
  }
  func.func @transform_1(%arg0: i32, %arg1: i32, %arg2: i32) -> (i32, i32, i32, i32) {
    %c1_i32 = arith.constant 1 : i32
    %0 = arith.muli %arg1, %c1_i32 : i32
    %1 = arith.addi %0, %arg2 : i32
    %c0_i32 = arith.constant 0 : i32
    %c0_i32_0 = arith.constant 0 : i32
    %c0_i32_1 = arith.constant 0 : i32
    return %arg0, %c0_i32, %c0_i32_0, %1 : i32, i32, i32, i32
  }
  func.func @transform_2(%arg0: i32, %arg1: i32, %arg2: i32) -> (i32, i32, i32) {
    %c1_i32 = arith.constant 1 : i32
    %0 = arith.muli %arg1, %c1_i32 : i32
    %1 = arith.addi %0, %arg2 : i32
    %c0_i32 = arith.constant 0 : i32
    %c0_i32_0 = arith.constant 0 : i32
    return %arg0, %c0_i32, %1 : i32, i32, i32
  }
  func.func @transform_3(%arg0: i32, %arg1: i32, %arg2: i32) -> (i32, i32, i32, i32) {
    %c0_i32 = arith.constant 0 : i32
    %c0_i32_0 = arith.constant 0 : i32
    %c0_i32_1 = arith.constant 0 : i32
    return %arg0, %arg1, %c0_i32, %c0_i32_0 : i32, i32, i32, i32
  }
  func.func @transform_4(%arg0: i32, %arg1: i32, %arg2: i32) -> (i32, i32, i32, i32) {
    %c0_i32 = arith.constant 0 : i32
    %c0_i32_0 = arith.constant 0 : i32
    %c0_i32_1 = arith.constant 0 : i32
    return %arg0, %arg1, %c0_i32, %c0_i32_0 : i32, i32, i32, i32
  }
}

</mosaic_0001>

<bundles_post_ra>
// kernel: tpu_custom_call.1
= control target key start
LH: loop header
LB: loop body
LE: loop exit
PB: predicated region body
PF: predicated region fallthrough
CT: control target
= control target key end

     0   :  { %s1197_s0 = inlined_call_operand.hbm [shape: f32[2,3,16,128], index: 0, kind: input, shape index: {}]   ;;  %s1198_s1 = inlined_call_operand.hbm [shape: f32[2,3,1,128], index: 1, kind: input, shape index: {}]   ;;  %s1199_s2 = inlined_call_operand.hbm [shape: f32[2,16,128], index: 2, kind: input, shape index: {}]   ;;  %s1200_s3 = inlined_call_operand.hbm [shape: f32[2,1,8,128], index: 3, kind: output, shape index: {0}]   ;;  %s1201_s4 = inlined_call_operand.hbm [shape: f32[2,1,8,128], index: 4, kind: output, shape index: {1}]  }
   0x1   :  { %1208 = sst [smem:[#allocation23_spill]] %s1198_s1 }
   0x2   :  { %10 = vsyncpa [#allocation5], 0 }
   0x3   :  { %12 = vsyncpa [#allocation5 + $0x1], 0 }
   0x4   :  { %13 = vsyncpa [#allocation8], 0 }
   0x5   :  { %15 = vsyncpa [#allocation8 + $0x1], 0 }
   0x6   :  { %16 = vsyncpa [#allocation6], 0 }
   0x7   :  { %18 = vsyncpa [#allocation6 + $0x1], 0 }
   0x8   :  { %19 = vsyncpa [#allocation12], 0 }
   0x9   :  { %21 = vsyncpa [#allocation12 + $0x1], 0  ;;  %s1016_s15 = smov 0   ;;  %s1018_s16 = smov 0  }
   0xa   :  { %s1020_s17 = smov 0   ;;  %s1022_s18 = smov 0  }
   0xb   :  { %s1024_s19 = smov 0   ;;  %s1026_s20 = smov 0  }
   0xc LB: > { %1209 = sst [smem:[#allocation17_spill]] %s964_s15  ;;  %s1047_s21 = sadd.s32 4294967295, %s984_s20   ;;  %s984_s20 = sphi %s1026_s20, %s27_s20   ;;  %s980_s19 = sphi %s1024_s19, %s1231_s19   ;;  %s976_s18 = sphi %s1022_s18, %s1230_s18   ;;  %s972_s17 = sphi %s1020_s17, %s1226_s17   ;;  %s968_s16 = sphi %s1018_s16, %s1229_s16   ;;  %s964_s15 = sphi %s1016_s15, %s1228_s15  }
   0xd   : > { %1210 = sst [smem:[#allocation18_spill]] %s972_s17  ;;  %s655_s22 = sadd.s32 4294967294, %s984_s20  }
   0xe   : > { %1211 = sst [smem:[#allocation19_spill]] %s984_s20  ;;  %s46_s23 = sadd.s32 1, %s980_s19 }
   0xf   : > { %s57_s24 = sadd.s32 1, %s972_s17  ;;  %p48_p0 = scmp.ge.s32.totalorder %s46_s23, 2 }
  0x10   : > { %p64_p1 = scmp.ne.s32.totalorder %s972_s17, %s968_s16  ;;  %p65_p2 = scmp.eq.s32.totalorder %s984_s20, 0 }
  0x11   : > { %p70_p3 = scmp.ne.s32.totalorder %s968_s16, %s964_s15  ;;  %s1233_s23 = smov (%p48_p0, %s46_s23), 0 }
  0x12   : > { %1212 = sst [smem:[#allocation20_spill]] %s1233_s23  ;;  %p1059_p4 = por %p65_p2, %p64_p1 }
  0x13   : > { %p71_p5 = scmp.eq.s32.totalorder %s1047_s21, 0  ;;  %s52_s26 = ssub.s32 %s980_s19, %s1233_s23 }
  0x14   : > { %p156_p6 = scmp.eq.s32.totalorder %s1047_s21, 1  ;;  %p55_p7 = scmp.eq.s32.totalorder %s52_s26, 0 }
  0x15   : > { %p1067_p8 = por %p71_p5, %p70_p3  ;;  %p162_p10 = scmp.eq.s32.totalorder %s655_s22, 1 }
  0x16   : > { %p1071_p9 = por %p156_p6, %p64_p1  ;;  %p657_p12 = scmp.ge.s32.totalorder %s984_s20, 2 }
  0x17   : > { %s1076_s29 = scalar_select %p55_p7, %s972_s17, %s57_s24  }
  0x18   : > { %p1078_p11 = por %p162_p10, %p70_p3  ;;  %p718_p13 = scmp.lt.s32.totalorder %s984_s20, 2 }
  0x19   : > { %1216 = sst [smem:[#allocation21_spill]] %s1076_s29  ;;  %s1085_s5 = sand.u32 1, %s972_s17  }
  0x1a   : > { %s1217_s30 = scalar_select %p1078_p11, 1, 0 }
  0x1b   : > { %s234_s6 = sand.u32 1, %s984_s20   ;;  %s683_s7 = smul.u32 3, %s1085_s5 }
  0x1c   : > { %1218 = sst [smem:[#allocation22_spill]] %s1217_s30  ;;  %p1091_p0 = pnand %p718_p13, %p1059_p4 }
  0x1d   : > { %s684_s9 = smul.u32 3, %s980_s19  ;;  %s238_s10 = scalar_lea.vmem [#allocation7], %s683_s7 }
  0x1e   : > { %s247_s11 = sshll.u32 %s238_s10, 4  ;;  %s1220_s1 = sld [smem:[#allocation23_spill]]  ;;  %s248_s11 = int_to_ptr.vmem [resolvable:$true] %s247_s11 }
  0x1f   : > { %s1099_s24 = scalar_lea.sflag [#allocation8], %s234_s6  ;;  %s986_s25 = smov 16  }
  0x20   : > { %s987_s26 = smov 1   ;;  %p662_p1 = scmp.ge.s32.totalorder %s984_s20, 1 }
  0x21   : > { %p279_p2 = scmp.lt.s32.totalorder %s984_s20, 3  ;;  %s682_s10 = smul.u32 48, %s980_s19 }
  0x22   : > { %s659_s12 = sshll.u32 %s1085_s5, 4  ;;  %s680_s29 = sshll.u32 %s980_s19, 4 }
  0x23   : > { %p1106_p3 = pnand %p662_p1, %p279_p2  ;;  %s261_s17 = scalar_lea.vmem [#allocation9], %s659_s12 }
  0x24   : > { %s244_s14 = scalar_lea.hbm %s1220_s1, %s684_s9  ;;  %s681_s9 = smul.u32 48, %s1085_s5 }
  0x25   : > { %s245_s22 = sshll.u32 %s244_s14, 4  ;;  %s221_s14 = scalar_lea.hbm %s1197_s0, %s682_s10  ;;  %s246_s22 = int_to_ptr.hbm [resolvable:$true] %s245_s22 }
  0x26   : > { %707 = dma.hbm_to_vmem [thread:$0]  (!%p1091_p0), %s246_s22, 48, %s248_s11, %s1099_s24, %s986_s25, %s986_s25, %s987_s26  }
  0x27   : > { %s214_s1 = scalar_lea.vmem [#allocation4], %s681_s9  ;;  %s222_s11 = sshll.u32 %s221_s14, 4  ;;  %s223_s11 = int_to_ptr.hbm [resolvable:$true] %s222_s11 }
  0x28   : > { %s224_s23 = sshll.u32 %s214_s1, 4  ;;  %s211_s22 = scalar_lea.sflag [#allocation5], %s1085_s5  ;;  %s225_s23 = int_to_ptr.vmem [resolvable:$true] %s224_s23 }
  0x29   : > { %s988_s25 = smov 128   ;;  %s989_s26 = smov 8  }
  0x2a   : > { %704 = dma.hbm_to_vmem [thread:$0]  (!%p1091_p0), %s223_s11, 768, %s225_s23, %s211_s22, %s988_s25, %s988_s25, %s989_s26  }
  0x2b   : > { %s271_s20 = sshll.u32 %s261_s17, 4  ;;  %s268_s13 = scalar_lea.hbm %s1199_s2, %s680_s29  ;;  %s272_s20 = int_to_ptr.vmem [resolvable:$true] %s271_s20 }
  0x2c   : > { %s269_s9 = sshll.u32 %s268_s13, 4  ;;  %283 = sbr.rel (%p1106_p3) target bundleno = 268 (0x10c), region = 32  ;;  %s270_s9 = int_to_ptr.hbm [resolvable:$true] %s269_s9 }
  0x2d   : > { %710 = dma.hbm_to_vmem [thread:$0]  (!%p1091_p0), %s270_s9, 256, %s272_s20, %s1099_s24, %s988_s25, %s988_s25, %s989_s26  }
  0x2e   : > { %s1129_s1 = sand.u32 (!%p1106_p3), 1, %s968_s16  }
  0x2f   : > { %s685_s23 = smul.u32 (!%p1106_p3), 48, %s1129_s1  ;;  %s286_s17 = scalar_lea.sflag (!%p1106_p3), [#allocation5], %s1129_s1 }
  0x31   : > { %s289_s5 = scalar_lea.vmem [#allocation4], %s685_s23 }
  0x32   : > { %947 = dma.done.wait (%p1067_p8), %s286_s17, 768  }
  0x33   : > { %949 = vsyncadd (%p1067_p8), %s286_s17, 4294966528  ;;  %s295_s15 = sand.u32 1, %s1047_s21   ;;  %s686_s20 = smul.u32 3, %s1129_s1 }
  0x34   : > { %s296_s29 = scalar_lea.sflag [#allocation8], %s295_s15 }
  0x35   : > { %s299_s30 = scalar_lea.vmem [#allocation7], %s686_s20 }
  0x36   : > { %951 = dma.done.wait (%p1067_p8), %s296_s29, 304  }
  0x37   : > { %953 = vsyncadd (%p1067_p8), %s296_s29, 4294966992  ;;  %v361_v0 = vld [vmem:[%s289_s5] sm:$0xff]  ;;  %v362_v1 = vld [vmem:[%s289_s5 + $0x8] sm:$0xff]  ;;  %s663_s8 = sshll.u32 %s1129_s1, 4  ;;  %v990_v28 = vmov 0.0   ;;  %s676_s27 = sshll.u32 %s976_s18, 3 }
  0x38   : > { %v666_v2 = vld [vmem:[%s289_s5 + $0x10] sm:$0xff]  ;;  %v667_v3 = vld [vmem:[%s289_s5 + $0x18] sm:$0xff]  ;;  %v668_v4 = vld [vmem:[%s289_s5 + $0x20] sm:$0xff]  ;;  %s309_s21 = scalar_lea.vmem [#allocation9], %s663_s8  ;;  %s664_s24 = sshll.u32 %s1129_s1, 3 }
  0x39   : > { %v669_v5 = vld [vmem:[%s289_s5 + $0x28] sm:$0xff]  ;;  %v773_v6 = vld [vmem:[%s299_s30] ss:$0 sm:$0xff]  ;;  %v774_v7 = vld [vmem:[%s299_s30 + $0x1] ss:$0 sm:$0xff]  ;;  %s467_s12 = scalar_lea.hbm %s1200_s3, %s676_s27  ;;  %s342_s6 = scalar_lea.vmem [#allocation10], %s664_s24 }
  0x3a   : > { %v775_v8 = vld [vmem:[%s299_s30 + $0x2] ss:$0 sm:$0xff]  ;;  %v379_v9 = vmul.f32 %v773_v6, %v361_v0  ;;  %v380_v10 = vmul.f32 %v773_v6, %v362_v1  ;;  %v384_v11 = vmul.f32 %v774_v7, %v666_v2  ;;  %v385_v12 = vmul.f32 %v774_v7, %v667_v3  ;;  %v374_v19 = vld [vmem:[%s309_s21] sm:$0xff]  ;;  %s469_s14 = sshll.u32 %s342_s6, 4  ;;  %s471_s11 = sshll.u32 %s467_s12, 4  ;;  %s470_s14 = int_to_ptr.vmem [resolvable:$true] %s469_s14  ;;  %s472_s11 = int_to_ptr.hbm [resolvable:$true] %s471_s11 }
  0x3b   : > { %v391_v13 = vmul.f32 %v775_v8, %v668_v4  ;;  %v392_v14 = vmul.f32 %v775_v8, %v669_v5  ;;  %v375_v20 = vld [vmem:[%s309_s21 + $0x8] sm:$0xff]  ;;  %s482_s13 = scalar_lea.hbm %s1201_s4, %s676_s27  ;;  %s451_s9 = scalar_lea.sflag [#allocation6], %s1129_s1 }
  0x3c   : > { %v386_v15 = vadd.f32 %v384_v11, %v379_v9  ;;  %v387_v16 = vadd.f32 %v385_v12, %v380_v10  ;;  %s880_s18 = sshra.s32 %s472_s11, 4  ;;  %s886_s15 = scalar_lea.hbm %s1200_s3, 16  ;;  %s881_s18 = int_to_ptr.hbm [resolvable:$true] %s880_s18 }
  0x3d   : > { %s882_s23 = scalar_lea.hbm %s881_s18, 8  ;;  %p887_p7 = scmp.lt.s32.totalorder %s881_s18, %s1200_s3 }
  0x3e   : > { %v393_v17 = vadd.f32 %v391_v13, %v386_v15  ;;  %v394_v18 = vadd.f32 %v392_v14, %v387_v16  ;;  %p883_p4 = scmp.ne.s32.totalorder %s881_s18, %s882_s23  ;;  %p888_p8 = scmp.lt.s32.totalorder %s886_s15, %s882_s23 }
  0x40   : > { %v395_v21 = vmin.f32 %v393_v17, 0.0  ;;  %v396_v22 = vmin.f32 %v394_v18, 0.0  ;;  %vm409_vm0 = vcmp.lt.f32.partialorder %v393_v17, 0.0  ;;  %vm410_vm1 = vcmp.lt.f32.partialorder %v394_v18, 0.0  ;;  %p884_p5 = pnand %p883_p4, %p1071_p9  ;;  %p889_p10 = por %p888_p8, %p887_p7 }
  0x41   : > { %v672_v29 = vsel %vm409_vm0, 1.0, %v990_v28  ;;  %v673_v30 = vsel %vm410_vm1, 1.0, %v990_v28 }
  0x42   : > { %v399_v23 = vmul.f32 %v395_v21, %v374_v19  ;;  %v400_v24 = vmul.f32 %v396_v22, %v375_v20  ;;  %v438_v31 = vadd.f32 %v673_v30, %v672_v29  ;;  %p885_p6 = pneg %p884_p5 }
  0x44   : > { %v401_v25 = vmul.f32 %v399_v23, %v395_v21  ;;  %v402_v26 = vmul.f32 %v400_v24, %v396_v22  ;;  %p890_p13 = pnand %p889_p10, %p885_p6 }
  0x46   : > { %v424_v27 = vadd.f32 %v402_v26, %v401_v25 }
  0x48   : > { %425 = vadd.xlane.f32.xlu0 %v424_v27 }
  0x50   : > { %439 = vadd.xlane.f32.xlu0 %v438_v31 }
  0xbb   : > { %v426_v32 = vpop.xlane.xlu0 %425 }
  0xbc   : > { %v427_v33 = vrot.slane %v426_v32, 4 }
  0xbe   : > { %v428_v34 = vadd.f32 %v427_v33, %v426_v32 }
  0xc0   : > { %v429_v35 = vrot.slane %v428_v34, 2 }
  0xc2   : > { %v430_v36 = vadd.f32 %v429_v35, %v428_v34 }
  0xc3   : > { %v440_v37 = vpop.xlane.xlu0 %439 }
  0xc4   : > { %v441_v38 = vrot.slane %v440_v37, 4  ;;  %v431_v39 = vrot.slane %v430_v36, 1 }
  0xc6   : > { %v442_v40 = vadd.f32 %v441_v38, %v440_v37  ;;  %v432_v41 = vadd.f32 %v431_v39, %v430_v36 }
  0xc8   : > { %v443_v42 = vrot.slane %v442_v40, 2  ;;  %687 = vpush %v432_v41 }
  0xca   : > { %v444_v43 = vadd.f32 %v443_v42, %v442_v40 }
  0xcc   : > { %v445_v44 = vrot.slane %v444_v43, 1 }
  0xce   : > { %v446_v45 = vadd.f32 %v445_v44, %v444_v43 }
  0xd0   : > { %689 = vpush %v446_v45 }
  0xf9   : > { %s688_s22 = spop %687 }
  0xfa   : > { %v434_v46 = vstv %s688_s22 }
  0xfb   : > { %435 = vst [vmem:[%s342_s6] sm:$0xff] %v434_v46 }
  0xfc   : > { %893 = shalt.err (!%p890_p13)
}
  0xfd   : > { %697 = dma.vmem_to_hbm [thread:$0]  (%p1071_p9), %s470_s14, 128, %s472_s11, %s451_s9  }
  0xfe   : > { %s349_s30 = scalar_lea.vmem [#allocation11], %s664_s24  ;;  %s486_s21 = sshll.u32 %s482_s13, 4  ;;  %s487_s21 = int_to_ptr.hbm [resolvable:$true] %s486_s21 }
  0xff   : > { %s484_s8 = sshll.u32 %s349_s30, 4  ;;  %s456_s7 = scalar_lea.sflag [#allocation12], %s1129_s1  ;;  %s485_s8 = int_to_ptr.vmem [resolvable:$true] %s484_s8 }
 0x100   : > { %s908_s10 = sshra.s32 %s487_s21, 4  ;;  %s914_s14 = scalar_lea.hbm %s1201_s4, 16  ;;  %s909_s10 = int_to_ptr.hbm [resolvable:$true] %s908_s10 }
 0x101   : > { %s690_s27 = spop %689  ;;  %s910_s12 = scalar_lea.hbm %s909_s10, 8 }
 0x102   : > { %v448_v47 = vstv %s690_s27  ;;  %p911_p0 = scmp.ne.s32.totalorder %s909_s10, %s910_s12  ;;  %p915_p3 = scmp.lt.s32.totalorder %s909_s10, %s1201_s4 }
 0x103   : > { %449 = vst [vmem:[%s349_s30] sm:$0xff] %v448_v47  ;;  %p916_p4 = scmp.lt.s32.totalorder %s914_s14, %s910_s12 }
 0x104   : > { %p912_p1 = pnand %p911_p0, %p1071_p9 }
 0x105   : > { %p917_p5 = por %p916_p4, %p915_p3 }
 0x106   : > { %p913_p2 = pneg %p912_p1 }
 0x108   : > { %p918_p6 = pnand %p917_p5, %p913_p2 }
 0x10a   : > { %921 = shalt.err (!%p918_p6)
}
 0x10b   : > { %698 = dma.vmem_to_hbm [thread:$0]  (%p1071_p9), %s485_s8, 128, %s487_s21, %s456_s7  }
 0x10c PF: > { %s1222_s1 = sld [smem:[#allocation17_spill]]  ;;  %p712_p7 = pnand %p657_p12, %p1078_p11 }
 0x10d   : > { %s1224_s26 = sld [smem:[#allocation19_spill]] }
 0x10e   : > { %p713_p8 = pneg %p712_p7 }
 0x112   : > { %s498_s13 = sand.u32 1, %s1222_s1  }
 0x113   : > { %s499_s9 = scalar_lea.sflag [#allocation6], %s498_s13 }
 0x114   : > { %955 = dma.done.wait (%p713_p8), %s499_s9, 128  }
 0x115   : > { %957 = vsyncadd (%p713_p8), %s499_s9, 4294967168  ;;  %s509_s18 = scalar_lea.sflag [#allocation12], %s498_s13 }
 0x116   : > { %959 = dma.done.wait (%p713_p8), %s509_s18, 128  }
 0x117   : > { %961 = vsyncadd (%p713_p8), %s509_s18, 4294967168  ;;  %s27_s20 = sadd.s32 1, %s1224_s26   ;;  %s1225_s28 = sld [smem:[#allocation18_spill]] }
 0x118   : > { %p24_p10 = scmp.ge.s32.totalorder %s27_s20, 4   ;;  %s1226_s17 = sld [smem:[#allocation21_spill]] }
 0x119   : > { %s1227_s23 = sld [smem:[#allocation20_spill]]  ;;  %s1228_s15 = smov %s968_s16 }
 0x11a   : > { %s1230_s18 = smov %s980_s19 }
 0x11b   :  { %26 = sbr.rel (!%p24_p10) target bundleno = 12 (0xc), region = 130 }
 0x11d   : > { %s1229_s16 = smov %s1225_s28 }
 0x11f   : > { %s1231_s19 = smov %s1227_s23 }
 0x120   :  { %515 = vsyncpa [#allocation5], 1 }
 0x121   :  { %517 = vsyncpa [#allocation5 + $0x1], 1 }
 0x122   :  { %518 = vsyncpa [#allocation8], 1 }
 0x123   :  { %520 = vsyncpa [#allocation8 + $0x1], 1 }
 0x124   :  { %521 = vsyncpa [#allocation6], 1 }
 0x125   :  { %523 = vsyncpa [#allocation6 + $0x1], 1 }
 0x126   :  { %524 = vsyncpa [#allocation12], 1 }
 0x127   :  { %526 = vsyncpa [#allocation12 + $0x1], 1 }

</bundles_post_ra>
